<compile_context>
chip_gen: v5e
topology: v5e:2x2
jax: 0.10.0
libtpu: 0.0.40
codegen_flags: <defaults>
</compile_context>

<pallas_src>
import functools
import numpy as np
import jax
import jax.numpy as jnp
from jax.experimental import pallas as pl
from jax.experimental.pallas import tpu as pltpu


# ------------------------------- Pallas kernel --------------------------------

def _loc_embedding_kernel(loc_ref, o_ref, *, W):
    """loc_ref: (TB, 2) int32 in VMEM.  o_ref: (TB, Lp) int32, lane-dense one-hot."""
    tb, lp = o_ref.shape
    loc = loc_ref[...]                                        # (TB, 2)
    target = loc[:, 0:1] * W + loc[:, 1:2]                    # (TB, 1) flat index x*W + y

    pos = jax.lax.broadcasted_iota(jnp.int32, (tb, lp), 1)    # (TB, Lp)
    o_ref[...] = (pos == target).astype(o_ref.dtype)          # single compare + cast


# --------------------------------- wrapper ------------------------------------

def loc_embedding(loc, box_size, *, tile_b=2048):
    """Pallas equivalent of LocEmbedding.forward.

    loc: integer array of shape (..., 2) with 0 <= loc[..., 0] < H, 0 <= loc[..., 1] < W.
    Returns an int32 array of shape (..., H, W, 1) — the 2-D one-hot of (x, y).
    """
    H, W = box_size
    lead = loc.shape[:-1]
    B = int(np.prod(lead)) if lead else 1
    loc2 = loc.reshape(B, 2).astype(jnp.int32)

    L = H * W
    # Pad the lane (last) dimension to a multiple of 128 for unmasked vector stores.
    Lp = max(128, ((L + 127) // 128) * 128)

    # TB is either the full batch (small B) or 2048 (multiple of 8, ~2 MiB int32 tile).
    TB = B if B <= tile_b else tile_b
    grid = (pl.cdiv(B, TB),)

    out_flat = pl.pallas_call(
        functools.partial(_loc_embedding_kernel, W=W),
        out_shape=jax.ShapeDtypeStruct((B, Lp), jnp.int32),
        grid=grid,
        in_specs=[pl.BlockSpec((TB, 2), lambda i: (i, 0))],
        out_specs=pl.BlockSpec((TB, Lp), lambda i: (i, 0)),
        compiler_params=pltpu.CompilerParams(dimension_semantics=("parallel",)),
    )(loc2)

    if Lp != L:
        out_flat = out_flat[:, :L]
    return out_flat.reshape(*lead, H, W, 1)


# ----------------------------------- main --------------------------------------

def _numpy_ref(loc_np, box_size):
    lead = loc_np.shape[:-1]
    H, W = box_size
    flat = loc_np.reshape(-1, 2)
    ref = np.zeros((flat.shape[0], H, W, 1), dtype=np.int32)
    for b in range(flat.shape[0]):
        ref[b, flat[b, 0], flat[b, 1], 0] = 1
    return ref.reshape(*lead, H, W, 1)


if __name__ == "__main__":
    box_size = (16, 16)

    # --- primary check: (B, 2) input -----------------------------------------
    B = 2
    key = jax.random.PRNGKey(0)
    kx, ky = jax.random.split(key)
    loc = jnp.stack(
        [jax.random.randint(kx, (B,), 0, box_size[0]),
         jax.random.randint(ky, (B,), 0, box_size[1])],
        axis=-1,
    )                                                          # (B, 2) int32

    fwd = jax.jit(functools.partial(loc_embedding, box_size=box_size))
    out = fwd(loc)
    jax.block_until_ready(out)

    assert out.shape == (B, box_size[0], box_size[1], 1), out.shape
    assert out.dtype == jnp.int32, out.dtype
    out_np = np.asarray(out)
    assert np.array_equal(out_np, _numpy_ref(np.asarray(loc), box_size))
    assert int(out_np.sum()) == B

    # --- secondary check: multi-dim leading axes (3, 5, 2) --------------------
    k2x, k2y = jax.random.split(jax.random.PRNGKey(1))
    loc2 = jnp.stack(
        [jax.random.randint(k2x, (3, 5), 0, box_size[0]),
         jax.random.randint(k2y, (3, 5), 0, box_size[1])],
        axis=-1,
    )                                                          # (3, 5, 2) int32
    out2 = fwd(loc2)
    jax.block_until_ready(out2)
    assert out2.shape == (3, 5, box_size[0], box_size[1], 1), out2.shape
    out2_np = np.asarray(out2)
    assert np.array_equal(out2_np, _numpy_ref(np.asarray(loc2), box_size))
    assert int(out2_np.sum()) == 15

    print("KERNEL_OK")
</pallas_src>

<mosaic_0001>
module attributes {stable_mosaic.version = 11 : i64} {
  func.func @_loc_embedding_kernel(%arg0: i32, %arg1: memref<2x2xi32, #tpu.memory_space<vmem>>, %arg2: memref<2x256xi32, #tpu.memory_space<vmem>>) attributes {dimension_semantics = [#tpu.dimension_semantics<parallel>], iteration_bounds = array<i64: 1>, scalar_prefetch = 0 : i64, scratch_operands = 0 : i64, tpu.core_type = #tpu.core_type<tc>, window_params = [{transform_indices = @transform_0, window_bounds = array<i64: 2, 2>}, {transform_indices = @transform_1, window_bounds = array<i64: 2, 256>}]} {
    %c0 = arith.constant 0 : index
    %c0_0 = arith.constant 0 : index
    %0 = vector.load %arg1[%c0, %c0_0] : memref<2x2xi32, #tpu.memory_space<vmem>>, vector<2x2xi32>
    %1 = vector.extract_strided_slice %0 {offsets = [0, 0], sizes = [2, 1], strides = [1, 1]} : vector<2x2xi32> to vector<2x1xi32>
    %c16_i32 = arith.constant 16 : i32
    %2 = vector.broadcast %c16_i32 : i32 to vector<2x1xi32>
    %3 = arith.muli %1, %2 : vector<2x1xi32>
    %4 = vector.extract_strided_slice %0 {offsets = [0, 1], sizes = [2, 1], strides = [1, 1]} : vector<2x2xi32> to vector<2x1xi32>
    %5 = arith.addi %3, %4 : vector<2x1xi32>
    %6 = tpu.iota {dimensions = array<i32: 1>} : vector<2x256xi32>
    %7 = vector.broadcast %5 : vector<2x1xi32> to vector<2x256xi32>
    %8 = arith.cmpi eq, %6, %7 : vector<2x256xi32>
    %9 = arith.extui %8 : vector<2x256xi1> to vector<2x256xi32>
    %c0_1 = arith.constant 0 : index
    %c0_2 = arith.constant 0 : index
    %10 = vector.load %arg2[%c0_1, %c0_2] : memref<2x256xi32, #tpu.memory_space<vmem>>, vector<2x256xi32>
    tpu.vector_store %arg2[%c0_1, %c0_2], %9 {strides = array<i32>} : memref<2x256xi32, #tpu.memory_space<vmem>>, vector<2x256xi32>,
    return
  }
  func.func @transform_0(%arg0: i32) -> (i32, i32) {
    %c0_i32 = arith.constant 0 : i32
    %c0_i32_0 = arith.constant 0 : i32
    return %arg0, %c0_i32 : i32, i32
  }
  func.func @transform_1(%arg0: i32) -> (i32, i32) {
    %c0_i32 = arith.constant 0 : i32
    %c0_i32_0 = arith.constant 0 : i32
    return %arg0, %c0_i32 : i32, i32
  }
}

</mosaic_0001>

<bundles_post_ra>
// kernel: loc_embedding.1
= control target key start
LH: loop header
LB: loop body
LE: loop exit
PB: predicated region body
PF: predicated region fallthrough
CT: control target
= control target key end

     0   :  { %6 = vsyncpa [#allocation3], 0  ;;  %s76_s9 = smov [#allocation2]   ;;  %s95_s0 = inlined_call_operand.hbm [shape: s32[2,2], index: 0, kind: input, shape index: {}]   ;;  %s96_s1 = inlined_call_operand.vmem [shape: s32[2,256], index: 1, kind: output, shape index: {}]  }
   0x1   :  { %s12_s8 = sshll.u32 %s95_s0, 4  ;;  %s14_s10 = sshll.u32 %s76_s9, 4  ;;  %s13_s8 = int_to_ptr.hbm [resolvable:$true] %s12_s8  ;;  %s15_s10 = int_to_ptr.vmem [resolvable:$true] %s14_s10 }
   0x2   :  { %17 = dma.hbm_to_vmem [thread:$0]  %s13_s8, 32, %s15_s10, [#allocation3]  }
   0x3   :  { %74 = dma.done.wait [#allocation3], 32  }
   0x4   :  { %75 = vsyncadd [#allocation3], 4294967264  ;;  %v22_v0 = vld [vmem:[#allocation2] sm:$0x3]  ;;  %s77_s11 = smov 127   ;;  %v78_v1 = vmov 0   ;;  %v27_v5 = vlaneseq }
   0x5   :  { %24 = vrot.lane.b32.xlu0 %v22_v0, %s77_s11  ;;  %v23_v2 = vmul.u32 16, %v22_v0  ;;  %vm38_vm2 = vcmask 1041408  }
   0x6   :  { %49 = vset.pattern.permute.xlu0 %v78_v1  ;;  %v28_v6 = vand.u32 127, %v27_v5 }
   0x8   :  { %v29_v7 = vadd.s32 128, %v28_v6 }
  0x77   :  { %v25_v3 = vpop.permute.xlu0 %24 }
  0x78   :  { %v26_v4 = vadd.s32 %v25_v3, %v23_v2 }
  0x7a   :  { %31 = vperm.xlu0 %49, %v26_v4  }
  0xec   :  { %v32_v8 = vpop.permute.xlu0 %31 }
  0xed   :  { %vm33_vm0 = vcmp.eq.s32.totalorder %v28_v6, %v32_v8  ;;  %vm34_vm1 = vcmp.eq.s32.totalorder %v29_v7, %v32_v8 }
  0xee   :  { %v36_v9 = vsel %vm34_vm1, 1, %v78_v1  ;;  %v35_v11 = vsel %vm33_vm0, 1, %v78_v1 }
  0xef   :  { %v37_v10 = vrot.slane %v36_v9, 6 }
  0xf1   :  { %v39_v12 = vsel %vm38_vm2, %v35_v11, %v37_v10 }
  0xf2   :  { %40 = vst [vmem:[%s96_s1] sm:$0xf] %v39_v12 }
  0xf3   :  { %45 = vsyncpa [#allocation3], 1 }

</bundles_post_ra>
